<compile_context>
chip_gen: v7x
topology: tpu7x:2x2x1
jax: 0.10.0
libtpu: 0.0.40
codegen_flags: <defaults>
</compile_context>

<pallas_src>
import jax
import jax.numpy as jnp
from jax.experimental import pallas as pl
from jax.experimental.pallas import tpu as pltpu

IN_DIM = 5 + 12          # 17
HID = 64
NUM_ECONOMY = 8
NUM_ARMY = 4
NUM_LOGP = NUM_ECONOMY * NUM_ARMY   # 32
OUT_DIM = 1 + NUM_LOGP              # 33: [value | combined policy logp]
LN_EPS = 1e-5


def _layernorm_onepass(h, gamma, beta):
    # var = E[x^2] - mean^2 : one effective cross-lane pass instead of two.
    mu = jnp.mean(h, axis=-1, keepdims=True)
    ms = jnp.mean(h * h, axis=-1, keepdims=True)
    var = ms - mu * mu
    inv = jax.lax.rsqrt(var + LN_EPS)
    return (h - mu) * inv * gamma + beta


def model_kernel(x_ref, w1_ref, w2_ref, wh_ref, vecs_ref, bh_ref, out_ref):
    x = x_ref[...].astype(jnp.float32)

    b1 = vecs_ref[0:1, :]
    g1 = vecs_ref[1:2, :]
    bt1 = vecs_ref[2:3, :]
    b2 = vecs_ref[3:4, :]
    g2 = vecs_ref[4:5, :]
    bt2 = vecs_ref[5:6, :]

    # --- layer 1: Linear -> LayerNorm -> ReLU ---
    h = jnp.dot(x, w1_ref[...], preferred_element_type=jnp.float32) + b1
    h = jnp.maximum(_layernorm_onepass(h, g1, bt1), 0.0)

    # --- layer 2: Linear -> LayerNorm -> ReLU ---
    h = jnp.dot(h, w2_ref[...], preferred_element_type=jnp.float32) + b2
    h = jnp.maximum(_layernorm_onepass(h, g2, bt2), 0.0)

    # --- fused heads: col 0 = value, cols 1:33 = outer-sum policy logits ---
    heads = jnp.dot(h, wh_ref[...], preferred_element_type=jnp.float32) + bh_ref[...]

    # masked log-softmax over the 32 policy columns (column 0 passes through).
    col = jax.lax.broadcasted_iota(jnp.int32, (1, OUT_DIM), 1)
    is_pol = col >= 1
    masked = jnp.where(is_pol, heads, jnp.float32(-1e30))
    m = jnp.max(masked, axis=-1, keepdims=True)
    lse = m + jnp.log(jnp.sum(jnp.exp(masked - m), axis=-1, keepdims=True))
    out_ref[...] = heads - jnp.where(is_pol, lse, 0.0)


def prepare_params(params):
    """One-time packing: transpose weights, fuse heads, pack 1-D params."""
    (w1, b1, g1, bt1, w2, b2, g2, bt2, wv, bv, we, be, wa, ba) = params

    c = jnp.arange(NUM_LOGP)
    # E_expand[e, c] = 1 iff c // NUM_ARMY == e ;  A_tile[a, c] = 1 iff c % NUM_ARMY == a
    E_expand = (c[None, :] // NUM_ARMY == jnp.arange(NUM_ECONOMY)[:, None]).astype(jnp.float32)
    A_tile = (c[None, :] % NUM_ARMY == jnp.arange(NUM_ARMY)[:, None]).astype(jnp.float32)

    w_pol = we.T @ E_expand + wa.T @ A_tile            # (HID, 32)
    b_pol = be @ E_expand + ba @ A_tile                # (32,)
    w_heads = jnp.concatenate([wv.T, w_pol], axis=1)   # (HID, 33)
    b_heads = jnp.concatenate([bv, b_pol]).reshape(1, OUT_DIM)

    vecs = jnp.stack([b1, g1, bt1, b2, g2, bt2], axis=0)   # (6, HID)
    return (w1.T, w2.T, w_heads, vecs, b_heads)


def model_forward(x, prepared):
    w1t, w2t, w_heads, vecs, b_heads = prepared
    B = x.shape[0]

    TB = B if B <= 256 else 256
    grid = (pl.cdiv(B, TB),)

    def resident(shape):
        return pl.BlockSpec(shape, lambda i: (0, 0))

    out = pl.pallas_call(
        model_kernel,
        out_shape=jax.ShapeDtypeStruct((B, OUT_DIM), jnp.float32),
        grid=grid,
        in_specs=[
            pl.BlockSpec((TB, IN_DIM), lambda i: (i, 0)),   # x: blocked on batch
            resident(w1t.shape),
            resident(w2t.shape),
            resident(w_heads.shape),
            resident(vecs.shape),
            resident(b_heads.shape),
        ],
        out_specs=pl.BlockSpec((TB, OUT_DIM), lambda i: (i, 0)),
        compiler_params=pltpu.CompilerParams(
            dimension_semantics=("parallel",)),
    )(x, w1t, w2t, w_heads, vecs, b_heads)

    value = out[:, :1]
    logp = out[:, 1:]
    return value, logp


def init_params(key):
    """Deterministic PyTorch-style Linear init: U(-1/sqrt(fan_in), 1/sqrt(fan_in))."""
    def linear(k, out_d, in_d):
        k1, k2 = jax.random.split(k)
        bound = 1.0 / jnp.sqrt(float(in_d))
        w = jax.random.uniform(k1, (out_d, in_d), jnp.float32, -bound, bound)
        b = jax.random.uniform(k2, (out_d,), jnp.float32, -bound, bound)
        return w, b

    ks = jax.random.split(key, 5)
    w1, b1 = linear(ks[0], HID, IN_DIM)
    w2, b2 = linear(ks[1], HID, HID)
    wv, bv = linear(ks[2], 1, HID)
    we, be = linear(ks[3], NUM_ECONOMY, HID)
    wa, ba = linear(ks[4], NUM_ARMY, HID)
    g1 = jnp.ones((HID,), jnp.float32); bt1 = jnp.zeros((HID,), jnp.float32)
    g2 = jnp.ones((HID,), jnp.float32); bt2 = jnp.zeros((HID,), jnp.float32)
    return (w1, b1, g1, bt1, w2, b2, g2, bt2, wv, bv, we, be, wa, ba)


def reference_forward(x, params):
    """Pure-JAX reference of the PyTorch forward, for sanity checking."""
    (w1, b1, g1, bt1, w2, b2, g2, bt2, wv, bv, we, be, wa, ba) = params

    def ln(h, gamma, beta):
        mu = jnp.mean(h, axis=-1, keepdims=True)
        xc = h - mu
        var = jnp.mean(xc * xc, axis=-1, keepdims=True)
        return xc * jax.lax.rsqrt(var + LN_EPS) * gamma + beta

    h = x @ w1.T + b1
    h = jnp.maximum(ln(h, g1, bt1), 0.0)
    h = h @ w2.T + b2
    h = jnp.maximum(ln(h, g2, bt2), 0.0)
    value = h @ wv.T + bv
    eco = jax.nn.log_softmax(h @ we.T + be, axis=-1)
    army = jax.nn.log_softmax(h @ wa.T + ba, axis=-1)
    bz = x.shape[0]
    logp = (eco[:, :, None] + army[:, None, :]).reshape(bz, -1)
    return value, logp


if __name__ == "__main__":
    key = jax.random.PRNGKey(0)
    k_param, k_x = jax.random.split(key)
    params = init_params(k_param)
    prepared = prepare_params(params)

    B = 8
    x = jax.random.normal(k_x, (B, IN_DIM), jnp.float32)

    value, logp = model_forward(x, prepared)
    value, logp = jax.block_until_ready((value, logp))

    ref_value, ref_logp = reference_forward(x, params)
    assert value.shape == (B, 1) and logp.shape == (B, NUM_LOGP)
    assert jnp.allclose(value, ref_value, atol=1e-4, rtol=1e-4)
    assert jnp.allclose(logp, ref_logp, atol=1e-4, rtol=1e-4)

    print("KERNEL_OK")
</pallas_src>

<mosaic_0001>
module attributes {stable_mosaic.version = 11 : i64} {
  func.func @model_kernel(%arg0: i32, %arg1: memref<8x17xf32, #tpu.memory_space<vmem>>, %arg2: memref<17x64xf32, #tpu.memory_space<vmem>>, %arg3: memref<64x64xf32, #tpu.memory_space<vmem>>, %arg4: memref<64x33xf32, #tpu.memory_space<vmem>>, %arg5: memref<6x64xf32, #tpu.memory_space<vmem>>, %arg6: memref<1x33xf32, #tpu.memory_space<vmem>>, %arg7: memref<8x33xf32, #tpu.memory_space<vmem>>) attributes {dimension_semantics = [#tpu.dimension_semantics<parallel>], iteration_bounds = array<i64: 1>, scalar_prefetch = 0 : i64, scratch_operands = 0 : i64, tpu.core_type = #tpu.core_type<tc>, window_params = [{transform_indices = @transform_0, window_bounds = array<i64: 8, 17>}, {pipeline_mode = #tpu.pipeline_mode<synchronous>, transform_indices = @transform_1, window_bounds = array<i64: 17, 64>}, {pipeline_mode = #tpu.pipeline_mode<synchronous>, transform_indices = @transform_2, window_bounds = array<i64: 64, 64>}, {pipeline_mode = #tpu.pipeline_mode<synchronous>, transform_indices = @transform_3, window_bounds = array<i64: 64, 33>}, {pipeline_mode = #tpu.pipeline_mode<synchronous>, transform_indices = @transform_4, window_bounds = array<i64: 6, 64>}, {pipeline_mode = #tpu.pipeline_mode<synchronous>, transform_indices = @transform_5, window_bounds = array<i64: 1, 33>}, {transform_indices = @transform_6, window_bounds = array<i64: 8, 33>}]} {
    %c0 = arith.constant 0 : index
    %c0_0 = arith.constant 0 : index
    %0 = vector.load %arg1[%c0, %c0_0] : memref<8x17xf32, #tpu.memory_space<vmem>>, vector<8x17xf32>
    %c0_1 = arith.constant 0 : index
    %c0_2 = arith.constant 0 : index
    %1 = vector.load %arg5[%c0_1, %c0_2] : memref<6x64xf32, #tpu.memory_space<vmem>>, vector<1x64xf32>
    %c1 = arith.constant 1 : index
    %c0_3 = arith.constant 0 : index
    %2 = vector.load %arg5[%c1, %c0_3] : memref<6x64xf32, #tpu.memory_space<vmem>>, vector<1x64xf32>
    %c2 = arith.constant 2 : index
    %c0_4 = arith.constant 0 : index
    %3 = vector.load %arg5[%c2, %c0_4] : memref<6x64xf32, #tpu.memory_space<vmem>>, vector<1x64xf32>
    %c3 = arith.constant 3 : index
    %c0_5 = arith.constant 0 : index
    %4 = vector.load %arg5[%c3, %c0_5] : memref<6x64xf32, #tpu.memory_space<vmem>>, vector<1x64xf32>
    %c4 = arith.constant 4 : index
    %c0_6 = arith.constant 0 : index
    %5 = vector.load %arg5[%c4, %c0_6] : memref<6x64xf32, #tpu.memory_space<vmem>>, vector<1x64xf32>
    %c5 = arith.constant 5 : index
    %c0_7 = arith.constant 0 : index
    %6 = vector.load %arg5[%c5, %c0_7] : memref<6x64xf32, #tpu.memory_space<vmem>>, vector<1x64xf32>
    %c0_8 = arith.constant 0 : index
    %c0_9 = arith.constant 0 : index
    %7 = vector.load %arg2[%c0_8, %c0_9] : memref<17x64xf32, #tpu.memory_space<vmem>>, vector<17x64xf32>
    %cst = arith.constant dense<0.000000e+00> : vector<8x64xf32>
    %8 = tpu.matmul %0, %7, %cst {dimension_numbers = #tpu.dot_dimension_numbers<[1], [0], [0], [1], [0, 0, 1, 1], [], []>} : vector<8x17xf32>, vector<17x64xf32>, vector<8x64xf32> -> vector<8x64xf32>
    %9 = vector.broadcast %1 : vector<1x64xf32> to vector<8x64xf32>
    %10 = arith.addf %8, %9 : vector<8x64xf32>
    %cst_10 = arith.constant dense<0.000000e+00> : vector<8xf32>
    %11 = vector.multi_reduction <add>, %10, %cst_10 [1] : vector<8x64xf32> to vector<8xf32>
    %12 = vector.shape_cast %11 : vector<8xf32> to vector<8x1xf32>
    %cst_11 = arith.constant 6.400000e+01 : f32
    %13 = vector.broadcast %cst_11 : f32 to vector<8x1xf32>
    %14 = arith.divf %12, %13 : vector<8x1xf32>
    %15 = arith.mulf %10, %10 : vector<8x64xf32>
    %cst_12 = arith.constant dense<0.000000e+00> : vector<8xf32>
    %16 = vector.multi_reduction <add>, %15, %cst_12 [1] : vector<8x64xf32> to vector<8xf32>
    %17 = vector.shape_cast %16 : vector<8xf32> to vector<8x1xf32>
    %cst_13 = arith.constant 6.400000e+01 : f32
    %18 = vector.broadcast %cst_13 : f32 to vector<8x1xf32>
    %19 = arith.divf %17, %18 : vector<8x1xf32>
    %20 = arith.mulf %14, %14 : vector<8x1xf32>
    %21 = arith.subf %19, %20 : vector<8x1xf32>
    %cst_14 = arith.constant 9.99999974E-6 : f32
    %22 = vector.broadcast %cst_14 : f32 to vector<8x1xf32>
    %23 = arith.addf %21, %22 : vector<8x1xf32>
    %24 = math.rsqrt %23 : vector<8x1xf32>
    %25 = vector.broadcast %14 : vector<8x1xf32> to vector<8x64xf32>
    %26 = arith.subf %10, %25 : vector<8x64xf32>
    %27 = vector.broadcast %24 : vector<8x1xf32> to vector<8x64xf32>
    %28 = arith.mulf %26, %27 : vector<8x64xf32>
    %29 = vector.broadcast %2 : vector<1x64xf32> to vector<8x64xf32>
    %30 = arith.mulf %28, %29 : vector<8x64xf32>
    %31 = vector.broadcast %3 : vector<1x64xf32> to vector<8x64xf32>
    %32 = arith.addf %30, %31 : vector<8x64xf32>
    %cst_15 = arith.constant 0.000000e+00 : f32
    %33 = vector.broadcast %cst_15 : f32 to vector<8x64xf32>
    %34 = arith.maximumf %32, %33 : vector<8x64xf32>
    %c0_16 = arith.constant 0 : index
    %c0_17 = arith.constant 0 : index
    %35 = vector.load %arg3[%c0_16, %c0_17] : memref<64x64xf32, #tpu.memory_space<vmem>>, vector<64x64xf32>
    %cst_18 = arith.constant dense<0.000000e+00> : vector<8x64xf32>
    %36 = tpu.matmul %34, %35, %cst_18 {dimension_numbers = #tpu.dot_dimension_numbers<[1], [0], [0], [1], [0, 0, 1, 1], [], []>} : vector<8x64xf32>, vector<64x64xf32>, vector<8x64xf32> -> vector<8x64xf32>
    %37 = vector.broadcast %4 : vector<1x64xf32> to vector<8x64xf32>
    %38 = arith.addf %36, %37 : vector<8x64xf32>
    %cst_19 = arith.constant dense<0.000000e+00> : vector<8xf32>
    %39 = vector.multi_reduction <add>, %38, %cst_19 [1] : vector<8x64xf32> to vector<8xf32>
    %40 = vector.shape_cast %39 : vector<8xf32> to vector<8x1xf32>
    %cst_20 = arith.constant 6.400000e+01 : f32
    %41 = vector.broadcast %cst_20 : f32 to vector<8x1xf32>
    %42 = arith.divf %40, %41 : vector<8x1xf32>
    %43 = arith.mulf %38, %38 : vector<8x64xf32>
    %cst_21 = arith.constant dense<0.000000e+00> : vector<8xf32>
    %44 = vector.multi_reduction <add>, %43, %cst_21 [1] : vector<8x64xf32> to vector<8xf32>
    %45 = vector.shape_cast %44 : vector<8xf32> to vector<8x1xf32>
    %cst_22 = arith.constant 6.400000e+01 : f32
    %46 = vector.broadcast %cst_22 : f32 to vector<8x1xf32>
    %47 = arith.divf %45, %46 : vector<8x1xf32>
    %48 = arith.mulf %42, %42 : vector<8x1xf32>
    %49 = arith.subf %47, %48 : vector<8x1xf32>
    %cst_23 = arith.constant 9.99999974E-6 : f32
    %50 = vector.broadcast %cst_23 : f32 to vector<8x1xf32>
    %51 = arith.addf %49, %50 : vector<8x1xf32>
    %52 = math.rsqrt %51 : vector<8x1xf32>
    %53 = vector.broadcast %42 : vector<8x1xf32> to vector<8x64xf32>
    %54 = arith.subf %38, %53 : vector<8x64xf32>
    %55 = vector.broadcast %52 : vector<8x1xf32> to vector<8x64xf32>
    %56 = arith.mulf %54, %55 : vector<8x64xf32>
    %57 = vector.broadcast %5 : vector<1x64xf32> to vector<8x64xf32>
    %58 = arith.mulf %56, %57 : vector<8x64xf32>
    %59 = vector.broadcast %6 : vector<1x64xf32> to vector<8x64xf32>
    %60 = arith.addf %58, %59 : vector<8x64xf32>
    %cst_24 = arith.constant 0.000000e+00 : f32
    %61 = vector.broadcast %cst_24 : f32 to vector<8x64xf32>
    %62 = arith.maximumf %60, %61 : vector<8x64xf32>
    %c0_25 = arith.constant 0 : index
    %c0_26 = arith.constant 0 : index
    %63 = vector.load %arg4[%c0_25, %c0_26] : memref<64x33xf32, #tpu.memory_space<vmem>>, vector<64x33xf32>
    %cst_27 = arith.constant dense<0.000000e+00> : vector<8x33xf32>
    %64 = tpu.matmul %62, %63, %cst_27 {dimension_numbers = #tpu.dot_dimension_numbers<[1], [0], [0], [1], [0, 0, 1, 1], [], []>} : vector<8x64xf32>, vector<64x33xf32>, vector<8x33xf32> -> vector<8x33xf32>
    %c0_28 = arith.constant 0 : index
    %c0_29 = arith.constant 0 : index
    %65 = vector.load %arg6[%c0_28, %c0_29] : memref<1x33xf32, #tpu.memory_space<vmem>>, vector<1x33xf32>
    %66 = vector.broadcast %65 : vector<1x33xf32> to vector<8x33xf32>
    %67 = arith.addf %64, %66 : vector<8x33xf32>
    %68 = tpu.iota {dimensions = array<i32: 1>} : vector<1x33xi32>
    %c1_i32 = arith.constant 1 : i32
    %69 = vector.broadcast %c1_i32 : i32 to vector<1x33xi32>
    %70 = arith.cmpi sge, %68, %69 : vector<1x33xi32>
    %cst_30 = arith.constant -1.000000e+30 : f32
    %71 = vector.shape_cast %70 : vector<1x33xi1> to vector<1x33xi1>
    %72 = vector.broadcast %71 : vector<1x33xi1> to vector<8x33xi1>
    %73 = vector.broadcast %cst_30 : f32 to vector<8x33xf32>
    %74 = arith.select %72, %67, %73 : vector<8x33xi1>, vector<8x33xf32>
    %cst_31 = arith.constant dense<0xFF800000> : vector<8xf32>
    %75 = vector.multi_reduction <maximumf>, %74, %cst_31 [1] : vector<8x33xf32> to vector<8xf32>
    %76 = vector.shape_cast %75 : vector<8xf32> to vector<8x1xf32>
    %77 = vector.broadcast %76 : vector<8x1xf32> to vector<8x33xf32>
    %78 = arith.subf %74, %77 : vector<8x33xf32>
    %79 = math.exp %78 : vector<8x33xf32>
    %cst_32 = arith.constant dense<0.000000e+00> : vector<8xf32>
    %80 = vector.multi_reduction <add>, %79, %cst_32 [1] : vector<8x33xf32> to vector<8xf32>
    %81 = vector.shape_cast %80 : vector<8xf32> to vector<8x1xf32>
    %82 = math.log %81 : vector<8x1xf32>
    %83 = arith.addf %76, %82 : vector<8x1xf32>
    %cst_33 = arith.constant 0.000000e+00 : f32
    %84 = vector.shape_cast %70 : vector<1x33xi1> to vector<1x33xi1>
    %85 = vector.broadcast %84 : vector<1x33xi1> to vector<8x33xi1>
    %86 = vector.shape_cast %83 : vector<8x1xf32> to vector<8x1xf32>
    %87 = vector.broadcast %86 : vector<8x1xf32> to vector<8x33xf32>
    %88 = vector.broadcast %cst_33 : f32 to vector<8x33xf32>
    %89 = arith.select %85, %87, %88 : vector<8x33xi1>, vector<8x33xf32>
    %90 = arith.subf %67, %89 : vector<8x33xf32>
    %c0_34 = arith.constant 0 : index
    %c0_35 = arith.constant 0 : index
    %91 = vector.load %arg7[%c0_34, %c0_35] : memref<8x33xf32, #tpu.memory_space<vmem>>, vector<8x33xf32>
    tpu.vector_store %arg7[%c0_34, %c0_35], %90 {strides = array<i32>} : memref<8x33xf32, #tpu.memory_space<vmem>>, vector<8x33xf32>,
    return
  }
  func.func @transform_0(%arg0: i32) -> (i32, i32) {
    %c0_i32 = arith.constant 0 : i32
    %c0_i32_0 = arith.constant 0 : i32
    return %arg0, %c0_i32 : i32, i32
  }
  func.func @transform_1(%arg0: i32) -> (i32, i32) {
    %c0_i32 = arith.constant 0 : i32
    %c0_i32_0 = arith.constant 0 : i32
    %c0_i32_1 = arith.constant 0 : i32
    return %c0_i32, %c0_i32_0 : i32, i32
  }
  func.func @transform_2(%arg0: i32) -> (i32, i32) {
    %c0_i32 = arith.constant 0 : i32
    %c0_i32_0 = arith.constant 0 : i32
    %c0_i32_1 = arith.constant 0 : i32
    return %c0_i32, %c0_i32_0 : i32, i32
  }
  func.func @transform_3(%arg0: i32) -> (i32, i32) {
    %c0_i32 = arith.constant 0 : i32
    %c0_i32_0 = arith.constant 0 : i32
    %c0_i32_1 = arith.constant 0 : i32
    return %c0_i32, %c0_i32_0 : i32, i32
  }
  func.func @transform_4(%arg0: i32) -> (i32, i32) {
    %c0_i32 = arith.constant 0 : i32
    %c0_i32_0 = arith.constant 0 : i32
    %c0_i32_1 = arith.constant 0 : i32
    return %c0_i32, %c0_i32_0 : i32, i32
  }
  func.func @transform_5(%arg0: i32) -> (i32, i32) {
    %c0_i32 = arith.constant 0 : i32
    %c0_i32_0 = arith.constant 0 : i32
    %c0_i32_1 = arith.constant 0 : i32
    return %c0_i32, %c0_i32_0 : i32, i32
  }
  func.func @transform_6(%arg0: i32) -> (i32, i32) {
    %c0_i32 = arith.constant 0 : i32
    %c0_i32_0 = arith.constant 0 : i32
    return %arg0, %c0_i32 : i32, i32
  }
}

</mosaic_0001>

<bundles_post_ra>
// kernel: tpu_custom_call.1
= control target key start
LH: loop header
LB: loop body
LE: loop exit
PB: predicated region body
PF: predicated region fallthrough
CT: control target
= control target key end

     0   :  { %v522_v2 = vmov 0.0|0.0   ;;  %vm523_vm0 = vmmov 0   ;;  %v524_v4 = vmov 0.0   ;;  %s674_s0 = inlined_call_operand.vmem [shape: f32[8,17], index: 0, kind: input, shape index: {}]   ;;  %s675_s1 = inlined_call_operand.vmem [shape: f32[17,64], index: 1, kind: input, shape index: {}]   ;;  %s676_s2 = inlined_call_operand.vmem [shape: f32[64,64], index: 2, kind: input, shape index: {}]   ;;  %s677_s3 = inlined_call_operand.vmem [shape: f32[64,33], index: 3, kind: input, shape index: {}]   ;;  %s678_s4 = inlined_call_operand.vmem [shape: f32[6,64], index: 4, kind: input, shape index: {}]   ;;  %s679_s5 = inlined_call_operand.vmem [shape: f32[1,33], index: 5, kind: input, shape index: {}]   ;;  %s680_s6 = inlined_call_operand.hbm [shape: f32[8,33], index: 6, kind: output, shape index: {}]  }
   0x1   :  { %v31_v0 = vld [vmem:[%s675_s1] sm:$0xff]  ;;  %v32_v1 = vld [vmem:[%s675_s1 + $0x8] sm:$0xff]  ;;  %459 = vmatprep.subr.bf16.mxu0 %v522_v2  ;;  %462 = vmatprep.subr.bf16.mxu1 %v522_v2 }
   0x2   :  { %v460_v3 = vpack.c.bf16 %v32_v1, %v31_v0  ;;  %418 = vmatprep.mubr.msk.f32.mxu0 %vm523_vm0, %v524_v4  ;;  %437 = vmatprep.mubr.msk.f32.mxu1 %vm523_vm0, %v524_v4 }
   0x3   :  { %11 = vsyncpa [#allocation3], 0  ;;  %v33_v5 = vld [vmem:[%s675_s1 + $0x10] sm:$0x1]  ;;  %vm42_vm1 = vcmask 1040384   ;;  %v24_v6 = vld [vmem:[%s674_s0] sm:$0xff] }
   0x4   :  { %461 = vmatpush3.bf16.msra.mxu0 %v460_v3  ;;  %vm38_vm2 = vcmask 138240   ;;  %v379_v7 = vld [vmem:[%s678_s4] ss:$0 sm:$0xff]  ;;  %vm116_vm3 = vcmask 523264   ;;  %v145_v15 = vld [vmem:[%s676_s2 + $0x8] sm:$0xff]  ;;  %v146_v16 = vld [vmem:[%s676_s2 + $0x10] sm:$0xff] }
   0x5   :  { %416 = vmatprep.subr.mxu0 %v524_v4  ;;  %v144_v14 = vld [vmem:[%s676_s2] sm:$0xff]  ;;  %v147_v18 = vld [vmem:[%s676_s2 + $0x18] sm:$0xff]  ;;  %v149_v21 = vld [vmem:[%s676_s2 + $0x28] sm:$0xff]  ;;  %vm349_vm5 = vcmask 269312  }
   0x6   :  { %v463_v17 = vpack.c.bf16 %v145_v15, %v144_v14  ;;  %v466_v19 = vpack.c.bf16 %v147_v18, %v146_v16  ;;  %v148_v20 = vld [vmem:[%s676_s2 + $0x20] sm:$0xff]  ;;  %v150_v23 = vld [vmem:[%s676_s2 + $0x30] sm:$0xff]  ;;  %v151_v24 = vld [vmem:[%s676_s2 + $0x38] sm:$0xff] }
   0x7   :  { %v469_v22 = vpack.c.bf16 %v149_v21, %v148_v20  ;;  %v472_v25 = vpack.c.bf16 %v151_v24, %v150_v23  ;;  %v382_v35 = vld [vmem:[%s678_s4 + $0x1] ss:$0 sm:$0xff]  ;;  %v383_v37 = vld [vmem:[%s678_s4 + $0x2] ss:$0 sm:$0xff]  ;;  %v384_v41 = vld [vmem:[%s678_s4 + $0x3] ss:$0 sm:$0xff] }
   0x8   :  { %417 = vmatpush3.msk.msra.mxu0 %vm42_vm1, %v33_v5  ;;  %464 = vmatpush3.bf16.msra.mxu1 %v463_v17  ;;  %v255_v48 = vld [vmem:[%s677_s3] sm:$0xff]  ;;  %v256_v49 = vld [vmem:[%s677_s3 + $0x8] sm:$0xff]  ;;  %v257_v51 = vld [vmem:[%s677_s3 + $0x10] sm:$0xff] }
   0x9   :  { %419 = vmatmul.mubr.msk.f32.vlgmr.msra.gmra.mrb[0].mxu0 %vm38_vm2, %v24_v6  ;;  %474 = vmatprep.subr.bf16.mxu0 %v522_v2  ;;  %v475_v50 = vpack.c.bf16 %v256_v49, %v255_v48  ;;  %v258_v52 = vld [vmem:[%s677_s3 + $0x18] sm:$0xff]  ;;  %v259_v54 = vld [vmem:[%s677_s3 + $0x20] sm:$0xff]  ;;  %v260_v55 = vld [vmem:[%s677_s3 + $0x28] sm:$0xff] }
   0xa   :  { %456 = vmatprep.mubr.msk.f32.mxu0 %vm523_vm0, %v524_v4  ;;  %465 = vmatprep.subr.bf16.mxu1 %v522_v2  ;;  %v478_v53 = vpack.c.bf16 %v258_v52, %v257_v51  ;;  %v481_v56 = vpack.c.bf16 %v260_v55, %v259_v54  ;;  %v261_v57 = vld [vmem:[%s677_s3 + $0x30] sm:$0xff]  ;;  %v262_v58 = vld [vmem:[%s677_s3 + $0x38] sm:$0xff]  ;;  %v386_v6 = vld [vmem:[%s678_s4 + $0x4] ss:$0 sm:$0xff] }
   0xb   :  { %476 = vmatpush3.bf16.msra.mxu0 %v475_v50  ;;  %v484_v59 = vpack.c.bf16 %v262_v58, %v261_v57 }
   0xc   :  { %467 = vmatpush3.bf16.msra.mxu1 %v466_v19  ;;  %477 = vmatprep.subr.bf16.mxu0 %v522_v2 }
   0xd   :  { %468 = vmatprep.subr.bf16.mxu1 %v522_v2 }
   0xf   :  { %479 = vmatpush3.bf16.msra.mxu0 %v478_v53 }
  0x10   :  { %470 = vmatpush3.bf16.msra.mxu1 %v469_v22  ;;  %480 = vmatprep.subr.bf16.mxu0 %v522_v2 }
  0x11   :  { %471 = vmatprep.subr.bf16.mxu1 %v522_v2 }
  0x13   :  { %482 = vmatpush3.bf16.msra.mxu0 %v481_v56 }
  0x14   :  { %473 = vmatpush3.bf16.msra.mxu1 %v472_v25  ;;  %483 = vmatprep.subr.bf16.mxu0 %v522_v2  ;;  %v387_v2 = vld [vmem:[%s678_s4 + $0x5] ss:$0 sm:$0xff]  ;;  %s525_s4 = smov [#allocation2]  }
  0x17   :  { %485 = vmatpush3.bf16.msra.mxu0 %v484_v59 }
  0xdc   :  { %v112_v8 = vpop.f32.mrb[0].mxu0 }
  0xdd   :  { %v113_v9 = vadd.f32 %v379_v7, %v112_v8  ;;  %v420_v10 = vpop.f32.mrb[1].mxu0 }
  0xdf   :  { %v117_v11 = vsel %vm116_vm3, %v113_v9, 0.0  ;;  %v122_v12 = vmul.f32 %v113_v9, %v113_v9 }
  0xe0   :  { %118 = vadd.xlane.f32.xlu0 %v117_v11  ;;  %v343_v11 = vlaneseq }
  0xe1   :  { %v123_v13 = vsel %vm116_vm3, %v122_v12, 0.0 }
  0xe2   :  { %v344_v12 = vand.u32 127, %v343_v11 }
  0xe4   :  { %124 = vadd.xlane.f32.xlu0 %v123_v13  ;;  %v388_v13 = vld [vmem:[%s679_s5] ss:$0 sm:$0xff]  ;;  %vm345_vm4 = vcmp.ge.s32.totalorder %v344_v12, 1  ;;  %s371_s5 = sshll.u32 %s525_s4, 4  ;;  %s372_s5 = int_to_ptr.vmem [resolvable:$true] %s371_s5 }
  0xe5   :  { %s498_s21 = scalar_lea.vmem %s372_s5, 128  ;;  %p503_p1 = scmp.lt.s32.totalorder %s372_s5, %s372_s5 }
  0xe6   :  { %p499_p0 = scmp.ne.s32.totalorder %s372_s5, %s498_s21  ;;  %p504_p2 = scmp.lt.s32.totalorder %s498_s21, %s498_s21 }
  0xe8   :  { %p505_p3 = por %p504_p2, %p503_p1 }
  0xea   :  { %p506_p4 = pnand %p505_p3, %p499_p0 }
 0x16d   :  { %v119_v26 = vpop.xlane.xlu0 %118 }
 0x16e   :  { %v121_v27 = vmul.f32 0.015625, %v119_v26 }
 0x170   :  { %v127_v29 = vmul.f32 %v121_v27, %v121_v27  ;;  %v131_v33 = vsub.f32 %v113_v9, %v121_v27 }
 0x171   :  { %v125_v28 = vpop.xlane.xlu0 %124 }
 0x172   :  { %v126_v30 = vmul.f32 0.015625, %v125_v28 }
 0x174   :  { %v128_v31 = vsub.f32 %v126_v30, %v127_v29 }
 0x176   :  { %v129_v32 = vadd.f32 1e-05, %v128_v31 }
 0x178   :  { %490 = vrsqrt.f32 %v129_v32 }
 0x182   :  { %v491_v34 = vpop.eup %490 }
 0x183   :  { %v132_v36 = vmul.f32 %v491_v34, %v131_v33 }
 0x185   :  { %v137_v38 = vmul.f32 %v382_v35, %v132_v36 }
 0x187   :  { %v142_v39 = vadd.f32 %v383_v37, %v137_v38 }
 0x189   :  { %v143_v40 = vmax.f32 %v142_v39, 0.0 }
 0x18b   :  { %438 = vmatmul.mubr.msk.f32.vlgmr.msra.gmra.mrb[0].mxu1 %vm116_vm3, %v143_v40 }
 0x25e   :  { %v225_v42 = vpop.f32.mrb[0].mxu1 }
 0x25f   :  { %v226_v43 = vadd.f32 %v384_v41, %v225_v42  ;;  %v439_v44 = vpop.f32.mrb[1].mxu1 }
 0x261   :  { %v229_v45 = vsel %vm116_vm3, %v226_v43, 0.0  ;;  %v233_v46 = vmul.f32 %v226_v43, %v226_v43 }
 0x262   :  { %230 = vadd.xlane.f32.xlu1 %v229_v45 }
 0x263   :  { %v234_v47 = vsel %vm116_vm3, %v233_v46, 0.0 }
 0x266   :  { %235 = vadd.xlane.f32.xlu1 %v234_v47 }
 0x2ef   :  { %v231_v60 = vpop.xlane.xlu1 %230 }
 0x2f0   :  { %v232_v61 = vmul.f32 0.015625, %v231_v60 }
 0x2f2   :  { %v238_v63 = vmul.f32 %v232_v61, %v232_v61  ;;  %v242_v4 = vsub.f32 %v226_v43, %v232_v61 }
 0x2f3   :  { %v236_v62 = vpop.xlane.xlu1 %235 }
 0x2f4   :  { %v237_v0 = vmul.f32 0.015625, %v236_v62 }
 0x2f6   :  { %v239_v1 = vsub.f32 %v237_v0, %v238_v63 }
 0x2f8   :  { %v240_v3 = vadd.f32 1e-05, %v239_v1 }
 0x2fa   :  { %492 = vrsqrt.f32 %v240_v3 }
 0x304   :  { %v493_v5 = vpop.eup %492 }
 0x305   :  { %v243_v7 = vmul.f32 %v493_v5, %v242_v4 }
 0x307   :  { %v248_v8 = vmul.f32 %v386_v6, %v243_v7 }
 0x309   :  { %v253_v9 = vadd.f32 %v387_v2, %v248_v8 }
 0x30b   :  { %v254_v10 = vmax.f32 %v253_v9, 0.0 }
 0x30d   :  { %457 = vmatmul.mubr.msk.f32.vlgmr.msra.gmra.mrb[2].mxu0 %vm116_vm3, %v254_v10 }
 0x3e0   :  { %v339_v14 = vpop.f32.mrb[2].mxu0 }
 0x3e1   :  { %v340_v15 = vadd.f32 %v388_v13, %v339_v14  ;;  %v458_v16 = vpop.f32.mrb[3].mxu0 }
 0x3e3   :  { %v348_v17 = vsel %vm345_vm4, %v340_v15, -1e+30 }
 0x3e4   :  { %v350_v18 = vsel %vm349_vm5, %v348_v17, -inf }
 0x3e5   :  { %351 = vmax.xlane.f32.xlu0 %v350_v18 }
 0x472   :  { %v352_v19 = vpop.xlane.xlu0 %351 }
 0x473   :  { %v353_v20 = vsub.f32 %v348_v17, %v352_v19 }
 0x475   :  { %v354_v21 = vmul.f32 1.442695, %v353_v20 }
 0x477   :  { %494 = vpow2.f32 %v354_v21 }
 0x481   :  { %v495_v22 = vpop.eup %494 }
 0x482   :  { %v356_v23 = vsel %vm349_vm5, %v495_v22, 0.0 }
 0x483   :  { %357 = vadd.xlane.f32.xlu1 %v356_v23 }
 0x510   :  { %v358_v24 = vpop.xlane.xlu1 %357 }
 0x511   :  { %496 = vlog2.f32 %v358_v24 }
 0x51b   :  { %v497_v25 = vpop.eup %496 }
 0x51c   :  { %v360_v26 = vmul.f32 0.6931472, %v497_v25 }
 0x51e   :  { %v361_v27 = vadd.f32 %v360_v26, %v352_v19 }
 0x520   :  { %v362_v28 = vsel %vm345_vm4, %v361_v27, 0.0 }
 0x521   :  { %v363_v29 = vsub.f32 %v340_v15, %v362_v28 }
 0x523   :  { %364 = vst.msk [vmem:[#allocation2] sm:$0xff] %vm349_vm5, %v363_v29 }
 0x524   :  { %509 = shalt.err (!%p506_p4)
}
 0x525   :  { %s510_s23 = scalar_lea.hbm %s680_s6, 128 }
 0x526   :  { %p511_p5 = scmp.ne.s32.totalorder %s680_s6, %s510_s23  ;;  %p514_p6 = scmp.lt.u32.totalorder %s510_s23, %s680_s6 }
 0x528   :  { %p516_p7 = pnand %p514_p6, %p511_p5 }
 0x52a   :  { %519 = shalt.err (!%p516_p7)
}
 0x52b   :  { %374 = dma.vmem_to_hbm [thread:$0]  %s372_s5, 128, %s680_s6, [#allocation3]  }
 0x52c   :  { %520 = dma.done.wait [#allocation3], 128  }
 0x52d   :  { %521 = vsyncadd [#allocation3], 4294967168 }
 0x52e   :  { %378 = vsyncpa [#allocation3], 1 }

</bundles_post_ra>
